<compile_context>
chip_gen: v7x
topology: tpu7x:2x2x1
jax: 0.10.0
libtpu: 0.0.40
codegen_flags: <defaults>
</compile_context>

<pallas_src>
import functools

import numpy as np
import jax
import jax.numpy as jnp
from jax import lax
from jax.experimental import pallas as pl
from jax.experimental.pallas import tpu as pltpu

F32 = jnp.float32
BF16 = jnp.bfloat16


# ----------------------------------------------------------------------------
# Batched centered 2-D DFT as a single row-matmul (Kronecker matrix).
# Used once for initialization (sens_reduce of the undersampled k-space) and
# for the sanity check in __main__.
# ----------------------------------------------------------------------------
def _cdft_rows_kernel(xr_ref, xi_ref, mr_ref, mi_ref, yr_ref, yi_ref):
    """Complex DFT of N flattened (H*W,) rows:  y = x @ M   (M = kron(L^T, R))."""
    xr = xr_ref[...]
    xi = xi_ref[...]
    mr = mr_ref[...]
    mi = mi_ref[...]
    dot = lambda a, b: jnp.dot(a, b, preferred_element_type=F32)
    yr_ref[...] = dot(xr, mr) - dot(xi, mi)
    yi_ref[...] = dot(xr, mi) + dot(xi, mr)


def _dft_rows(xr, xi, mr, mi):
    n, hw = xr.shape
    row = pl.BlockSpec((n, hw), lambda i: (0, 0))
    mat = pl.BlockSpec((hw, hw), lambda i: (0, 0))
    return pl.pallas_call(
        _cdft_rows_kernel,
        grid=(1,),
        in_specs=[row, row, mat, mat],
        out_specs=[row, row],
        out_shape=[jax.ShapeDtypeStruct((n, hw), F32)] * 2,
    )(xr, xi, mr, mi)


def fft2c(x, dft):
    xr, xi = x
    b, c, h, w = xr.shape
    yr, yi = _dft_rows(xr.reshape(b * c, h * w), xi.reshape(b * c, h * w), *dft['fwd'])
    return yr.reshape(b, c, h, w), yi.reshape(b, c, h, w)


def ifft2c(x, dft):
    xr, xi = x
    b, c, h, w = xr.shape
    yr, yi = _dft_rows(xr.reshape(b * c, h * w), xi.reshape(b * c, h * w), *dft['inv'])
    return yr.reshape(b, c, h, w), yi.reshape(b, c, h, w)


def make_dft_mats(h, w):
    """Centered orthonormal 2-D (I)DFT as one (H*W, H*W) complex matrix.

    Y = L X R with L the centered 1-D DFT along H and R = (centered 1-D DFT along W)^T.
    Row-major flattening:  y_flat = x_flat @ M,  M = kron(L^T, R).
    """
    def centered(n, inverse):
        eye = np.eye(n)
        fn = np.fft.ifft if inverse else np.fft.fft
        return np.fft.fftshift(fn(np.fft.ifftshift(eye, axes=0), axis=0, norm='ortho'),
                               axes=0)

    def kron_ri(lmat, rmat):
        m = np.kron(lmat.T, rmat)
        return jnp.asarray(m.real, F32), jnp.asarray(m.imag, F32)

    fh, fw = centered(h, False), centered(w, False)
    ih, iw = centered(h, True), centered(w, True)
    return {'fwd': kron_ri(fh, fw.T), 'inv': kron_ri(ih, iw.T)}


# ----------------------------------------------------------------------------
# Fused whole-recurrence kernel: grid = (batch, recurrent step)
# ----------------------------------------------------------------------------
def _fd2rt_fused_kernel(
        x0_ref, rf_ref, ku_ref, m_ref,
        fr_ref, fi_ref, br_ref, bi_ref,
        wks_ref, bks_ref,
        w1_ref, b1_ref, w2_ref, b2_ref, w3_ref, b3_ref,
        we_ref, be_ref, wqkv_ref, bqkv_ref, wo_ref, bo_ref,
        wco_ref, scal_ref,
        o_ref, x_sc, att_sc,
        *, scale, n_coils, emb, neg_slope, q_tile):
    r = pl.program_id(1)

    # Initialize the resident image state at the start of each batch element's
    # recurrence (x0 = sens_reduce(Target_Kspace_u, ones) = ifft2c(sum_c Ku_c)).
    @pl.when(r == 0)
    def _():
        x_sc[...] = x0_ref[...]

    dotf = lambda a, b: jnp.dot(a, b, preferred_element_type=F32)
    # NN-surrogate matmuls: bf16 weights (pre-cast on host) + bf16 activations,
    # f32 accumulation on the MXU.
    mm = lambda w_ref, x: jnp.dot(w_ref[...], x.astype(BF16),
                                  preferred_element_type=F32)
    leaky = lambda z: jnp.where(z >= 0, z, neg_slope * z)

    x_ch = x_sc[...]                          # (2, HW)  [real; imag]
    mask = m_ref[...]                         # (1, HW)
    ku = ku_ref[...]                          # (2, HW)  sum_c Ku_c  (== Ref_Kspace_f)
    ref_feat = rf_ref[...]                    # (4, HW)  [ref_r, ref_i, d/dx rss, d/dy rss]
    fr = fr_ref[...]
    fi = fi_ref[...]
    br = br_ref[...]
    bi = bi_ref[...]

    # ---- sens_expand(Target_img_f, ones): centered 2-D DFT, batched M=2 ------
    a_f = dotf(x_ch, fr)                      # rows: [xr@fr, xi@fr]
    b_f = dotf(x_ch, fi)                      # rows: [xr@fi, xi@fi]
    kfr = a_f[0:1] - b_f[1:2]
    kfi = b_f[0:1] + a_f[1:2]
    kf = jnp.concatenate([kfr, kfi], axis=0)  # (2, HW)

    # ---- collapsed 38->2 1x1 convs on [ref | target] k-space (block-diag 4x4) -
    kvec = jnp.concatenate([ku, kf], axis=0)                    # (4, HW)
    cnn_in = dotf(wks_ref[...], kvec) + bks_ref[...]            # (4, HW)

    # ---- NormNet surrogate: per-sample normalize -> 1x1-conv MLP -> unnorm ---
    # TODO(synk): CNN.NormNet internals are not provided; deterministic surrogate.
    mu = jnp.mean(jnp.mean(cnn_in, axis=1, keepdims=True), axis=0, keepdims=True)
    var = jnp.mean(jnp.mean((cnn_in - mu) ** 2, axis=1, keepdims=True),
                   axis=0, keepdims=True)
    std = jnp.sqrt(var) + 1e-6
    h1 = leaky(mm(w1_ref, (cnn_in - mu) / std) + b1_ref[...])   # (32, HW)
    h2 = leaky(mm(w2_ref, h1) + b2_ref[...])                    # (32, HW)
    cnn_out = (mm(w3_ref, h2) + b3_ref[...]) * std + mu         # (2, HW)

    # ---- ViT surrogate: embed -> global self-attention (query-blocked) -> head
    # TODO(synk): ViT.ViT internals are not provided; deterministic surrogate.
    vit_in = jnp.concatenate([x_ch, ref_feat], axis=0)          # (6, HW)
    emb_tok = leaky(mm(we_ref, vit_in) + be_ref[...])           # (E, HW)
    qkv = mm(wqkv_ref, emb_tok) + bqkv_ref[...]                 # (3E, HW)
    q = qkv[0:emb].astype(BF16)
    k = qkv[emb:2 * emb].astype(BF16)
    v = qkv[2 * emb:3 * emb].astype(BF16)
    inv_sqrt_e = 1.0 / float(emb) ** 0.5
    hw = x_ch.shape[-1]
    for qi in range(hw // q_tile):                              # static, small
        q_blk = q[:, qi * q_tile:(qi + 1) * q_tile]             # (E, TQ) bf16
        s = lax.dot_general(q_blk, k, (((0,), (0,)), ((), ())),
                            preferred_element_type=F32) * inv_sqrt_e  # (TQ, HW)
        s = s - jnp.max(s, axis=-1, keepdims=True)
        p = jnp.exp(s)                                          # f32 softmax
        p = p * pl.reciprocal(jnp.sum(p, axis=-1, keepdims=True), approx=True)
        att_sc[:, qi * q_tile:(qi + 1) * q_tile] = lax.dot_general(
            v, p.astype(BF16), (((1,), (1,)), ((), ())),
            preferred_element_type=F32)                         # (E, TQ)
    vit_out = mm(wo_ref, att_sc[...] + emb_tok) + bo_ref[...]   # (2, HW)

    # ---- data-consistency terms (all-ones sensitivity maps path) -------------
    step = scal_ref[r, 0]
    cnn_bias = scal_ref[r, 1]

    # sum_c mask*(mask*Kf - Ku_c) == mask*(mask*C*Kf - sum_c Ku_c)  (identical coils)
    rs_r = mask * (mask * (n_coils * kfr) - ku[0:1])
    rs_i = mask * (mask * (n_coils * kfi) - ku[1:2])

    # collapsed (2 -> n_coils) conv on CNN output + coil sum; imag part == 0
    cnn_eff = jnp.sum(cnn_out * wco_ref[...], axis=0, keepdims=True) + cnn_bias

    # one batched (3, HW) x (HW, HW) IDFT pair for term1 (complex) + term2 (real in)
    l3 = jnp.concatenate([rs_r, rs_i, cnn_eff], axis=0)         # (3, HW)
    p3 = dotf(l3, br)
    q3 = dotf(l3, bi)
    upd_r = 2.0 * (p3[0:1] - q3[1:2]) + scale * p3[2:3]
    upd_i = 2.0 * (q3[0:1] + p3[1:2]) + scale * q3[2:3]
    upd = jnp.concatenate([upd_r, upd_i], axis=0)               # (2, HW)

    x_new = x_ch - step * (upd + scale * vit_out)
    x_sc[...] = x_new
    o_ref[...] = x_new


def _stack_dcrb_params(dcrb_list, n_coils):
    """Collapse + stack per-iteration DCRB params along a leading recurrent axis."""
    def per_step(p):
        # 38->2 1x1 convs act on n_coils *identical* coil copies (sens == ones):
        # collapse exactly (linearity) to effective 2x2 convs, block-diag 4x4.
        wref = p['conv_ref_w'].reshape(2, 2, n_coils).sum(-1)
        wtgt = p['conv_target_w'].reshape(2, 2, n_coils).sum(-1)
        z22 = jnp.zeros((2, 2), F32)
        wks = jnp.concatenate(
            [jnp.concatenate([wref, z22], axis=1),
             jnp.concatenate([z22, wtgt], axis=1)], axis=0)         # (4, 4)
        bks = jnp.concatenate([p['conv_ref_b'], p['conv_target_b']]).reshape(4, 1)
        # (2 -> n_coils) conv + coil sum collapses to a 2-vector dot + scalar bias.
        wco = p['conv_cnn_out_w'].sum(axis=0).reshape(2, 1)
        scal = jnp.stack([p['stepsize'][0], p['conv_cnn_out_b'].sum()]).astype(F32)
        c, v = p['cnn'], p['vit']
        return dict(
            wks=wks, bks=bks, wco=wco, scal=scal,
            w1=c['w1'].astype(BF16), b1=c['b1'],
            w2=c['w2'].astype(BF16), b2=c['b2'],
            w3=c['w3'].astype(BF16), b3=c['b3'],
            we=v['we'].astype(BF16), be=v['be'],
            wqkv=v['wqkv'].astype(BF16), bqkv=v['bqkv'],
            wo=v['wo'].astype(BF16), bo=v['bo'])

    per = [per_step(p) for p in dcrb_list]
    return {k: jnp.stack([d[k] for d in per], axis=0) for k in per[0]}


def dcrb_recurrence(stacked, x0, ref_feat, ku, mask_flat, dft, *,
                    scale, n_coils, emb, num_recurrent):
    """Run all DCRB iterations in one pallas_call.  Returns (B, R, 2, HW)."""
    b, _, hw = x0.shape
    fr, fi = dft['fwd']
    br, bi = dft['inv']
    q_tile = 64 if hw % 64 == 0 else hw

    def per_batch(shape):
        return pl.BlockSpec((None,) + shape, lambda bb, rr: (bb,) + (0,) * len(shape))

    def per_step(shape):
        return pl.BlockSpec((None,) + shape, lambda bb, rr: (rr,) + (0,) * len(shape))

    def fixed(a):
        return pl.BlockSpec(a.shape, lambda bb, rr: (0,) * a.ndim)

    data_args = [x0, ref_feat, ku, mask_flat]
    data_specs = [per_batch((2, hw)), per_batch((4, hw)),
                  per_batch((2, hw)), per_batch((1, hw))]

    const_args = [fr, fi, br, bi]
    const_specs = [fixed(a) for a in const_args]

    step_keys = ['wks', 'bks', 'w1', 'b1', 'w2', 'b2', 'w3', 'b3',
                 'we', 'be', 'wqkv', 'bqkv', 'wo', 'bo', 'wco']
    step_args = [stacked[k] for k in step_keys]
    step_specs = [per_step(a.shape[1:]) for a in step_args]

    smem_spec = pl.BlockSpec(memory_space=pltpu.MemorySpace.SMEM)

    kern = functools.partial(
        _fd2rt_fused_kernel, scale=float(scale), n_coils=float(n_coils),
        emb=int(emb), neg_slope=0.01, q_tile=q_tile)

    return pl.pallas_call(
        kern,
        grid=(b, num_recurrent),
        in_specs=data_specs + const_specs + step_specs + [smem_spec],
        out_specs=pl.BlockSpec((None, None, 2, hw), lambda bb, rr: (bb, rr, 0, 0)),
        out_shape=jax.ShapeDtypeStruct((b, num_recurrent, 2, hw), F32),
        scratch_shapes=[pltpu.VMEM((2, hw), F32),       # resident Target_img_f
                        pltpu.VMEM((emb, hw), F32)],    # attention output tiles
        compiler_params=pltpu.CompilerParams(
            dimension_semantics=("parallel", "arbitrary")),
    )(*data_args, *const_args, *step_args, stacked['scal'])


# ----------------------------------------------------------------------------
# Cheap glue (plain JAX, one-time per forward)
# ----------------------------------------------------------------------------
def gradient(x):
    # TODO(synk): utils.gradient definition not provided; circular forward difference.
    dx = x - jnp.roll(x, 1, axis=-1)
    dy = x - jnp.roll(x, 1, axis=-2)
    return jnp.concatenate([dx, dy], axis=1)


def rss_complex(x):                      # utils.rss on a complex tensor
    return jnp.sqrt(jnp.sum(x[0] ** 2 + x[1] ** 2, axis=1, keepdims=True))


# ----------------------------------------------------------------------------
# fD2RT forward (self.coils == 1 path of the reference)
# ----------------------------------------------------------------------------
def fd2rt_forward(params, Ref_Kspace_f, Target_Kspace_u, mask, num_low_frequencies,
                  *, dft, num_recurrent, scale=0.1, embed_dim=32):
    kr, ki = Target_Kspace_u
    b, n_coils, h, w = kr.shape
    hw = h * w

    # fD2RT(coils=2) -> self.coils == 1: all-ones sensitivity maps; gate is unused.
    # TODO(synk): sensitivity_model.SensitivityModel / SMRB path (coils != 1) not provided.
    sens = (jnp.ones_like(kr), jnp.zeros_like(kr))

    # sens_reduce(Target_Kspace_u, ones) == ifft2c(sum_c Ku_c)   (exact, by linearity)
    kur = jnp.sum(kr, axis=1).reshape(b, hw)
    kui = jnp.sum(ki, axis=1).reshape(b, hw)
    xr0, xi0 = _dft_rows(kur, kui, *dft['inv'])

    img0 = (xr0.reshape(b, 1, h, w), xi0.reshape(b, 1, h, w))
    rec = [img0]

    if Ref_Kspace_f is not None:
        # TODO(synk): distinct-coil reference k-space path is not exercised in this
        # configuration and is not implemented in the collapsed/fused flow.
        raise NotImplementedError("Ref_Kspace_f != None path not implemented")

    if 2 * n_coils == 70:
        # Static early-return branch of the reference: every DCRB step is the identity.
        for _ in range(num_recurrent):
            rec.append(img0)
            rec.append(img0)
        return rec, rss_complex(img0), sens, img0

    # ds_ref features of the (iteration-invariant) reference image: [r, i, d/dx, d/dy]
    ref_rss = jnp.sqrt(img0[0] ** 2 + img0[1] ** 2)
    ref_feat = jnp.concatenate([img0[0], img0[1], gradient(ref_rss)],
                               axis=1).reshape(b, 4, hw)

    # Ref_Kspace_f = fft2c(ifft2c(sum_c Ku_c)) == sum_c Ku_c exactly (orthonormal,
    # centered transform) -> pass ku directly; no extra DFT kernel needed.
    ku = jnp.stack([kur, kui], axis=1)          # (b, 2, hw)
    x0 = jnp.stack([xr0, xi0], axis=1)          # (b, 2, hw)
    mask_flat = mask.reshape(b, 1, hw)

    # TODO(synk): the reference builds conv_ref / conv_target / conv(2->coils)
    # with fresh random weights inside forward(); here they are fixed parameters.
    stacked = _stack_dcrb_params(params['dcrb'], n_coils)

    out = dcrb_recurrence(stacked, x0, ref_feat, ku, mask_flat, dft,
                          scale=scale, n_coils=n_coils, emb=embed_dim,
                          num_recurrent=num_recurrent)

    for idx in range(num_recurrent):
        img = (out[:, idx, 0:1, :].reshape(b, 1, h, w),
               out[:, idx, 1:2, :].reshape(b, 1, h, w))
        rec.append(img)
        rec.append(img)

    tgt = rec[-1]
    return rec, rss_complex(tgt), sens, tgt


# ----------------------------------------------------------------------------
# Deterministic parameter init (weights stored as (Cout, Cin); biases as (Cout, 1))
# ----------------------------------------------------------------------------
def _winit(key, shape, s=0.1):
    return s * jax.random.normal(key, shape, F32)


def init_params(key, num_recurrent, coils_all, coils_data, embed_dim):
    params = {'dcrb': []}
    key, k0 = jax.random.split(key)
    params['stepsize'] = 0.1 * jax.random.uniform(k0, (1,), F32)   # only used by SMRB (skipped)
    e = embed_dim
    for _ in range(num_recurrent):
        key, *ks = jax.random.split(key, 11)
        params['dcrb'].append({
            'stepsize': 0.1 * jax.random.uniform(ks[0], (1,), F32),
            'conv_ref_w': _winit(ks[1], (2, 2 * coils_data)),
            'conv_ref_b': jnp.zeros((2,), F32),
            'conv_target_w': _winit(ks[2], (2, 2 * coils_data)),
            'conv_target_b': jnp.zeros((2,), F32),
            'conv_cnn_out_w': _winit(ks[3], (coils_data, 2)),
            'conv_cnn_out_b': jnp.zeros((coils_data,), F32),
            'cnn': {
                'w1': _winit(ks[4], (32, 2 * coils_all)), 'b1': jnp.zeros((32, 1), F32),
                'w2': _winit(ks[5], (32, 32)), 'b2': jnp.zeros((32, 1), F32),
                'w3': _winit(ks[6], (coils_all, 32)), 'b3': jnp.zeros((coils_all, 1), F32),
            },
            'vit': {
                'we': _winit(ks[7], (e, 6)), 'be': jnp.zeros((e, 1), F32),
                'wqkv': _winit(ks[8], (3 * e, e)), 'bqkv': jnp.zeros((3 * e, 1), F32),
                'wo': _winit(ks[9], (coils_all, e)), 'bo': jnp.zeros((coils_all, 1), F32),
            },
        })
    return params


# ----------------------------------------------------------------------------
# Main
# ----------------------------------------------------------------------------
if __name__ == "__main__":
    B, COILS_DATA, H, W = 2, 19, 16, 16      # 19 coils -> 38-channel conv branches taken
    COILS_ARG = 2                            # fD2RT(coils=2) -> self.coils == 1 path
    NUM_RECURRENT = 3
    EMBED_DIM = 32

    key = jax.random.PRNGKey(0)
    kdata, kparam = jax.random.split(key)
    k1, k2 = jax.random.split(kdata)
    kr = 0.1 * jax.random.normal(k1, (B, COILS_DATA, H, W), F32)
    ki = 0.1 * jax.random.normal(k2, (B, COILS_DATA, H, W), F32)

    cols = jnp.arange(W)
    col_mask = ((cols % 2) == 0) | ((cols >= W // 2 - 2) & (cols < W // 2 + 2))
    mask = jnp.tile(col_mask.astype(F32)[None, None, None, :], (B, 1, H, 1))
    Target_Kspace_u = (kr * mask, ki * mask)

    dft = make_dft_mats(H, W)

    # sanity-check the Pallas Kronecker DFT against XLA's FFT
    x_c = (kr + 1j * ki).astype(jnp.complex64)
    ref = jnp.fft.fftshift(jnp.fft.fft2(jnp.fft.ifftshift(x_c, axes=(-2, -1)), norm='ortho'),
                           axes=(-2, -1))
    got_r, got_i = fft2c((kr, ki), dft)
    np.testing.assert_allclose(np.asarray(got_r), np.asarray(ref.real), atol=2e-2, rtol=0)
    np.testing.assert_allclose(np.asarray(got_i), np.asarray(ref.imag), atol=2e-2, rtol=0)

    params = init_params(kparam, NUM_RECURRENT, COILS_ARG, COILS_DATA, EMBED_DIM)

    fwd = jax.jit(functools.partial(fd2rt_forward, dft=dft, num_recurrent=NUM_RECURRENT,
                                    embed_dim=EMBED_DIM))
    out = fwd(params, None, Target_Kspace_u, mask, 4)
    out = jax.block_until_ready(out)
    rec, rss_img, sens_maps, target_img = out

    assert len(rec) == 1 + 2 * NUM_RECURRENT
    assert target_img[0].shape == (B, 1, H, W) and rss_img.shape == (B, 1, H, W)
    assert bool(jnp.all(jnp.isfinite(target_img[0]))) and bool(jnp.all(jnp.isfinite(target_img[1])))
    assert bool(jnp.all(jnp.isfinite(rss_img)))

    print("KERNEL_OK")
</pallas_src>

<mosaic_0001>
module attributes {stable_mosaic.version = 11 : i64} {
  func.func @_cdft_rows_kernel(%arg0: i32, %arg1: memref<38x256xf32, #tpu.memory_space<vmem>>, %arg2: memref<38x256xf32, #tpu.memory_space<vmem>>, %arg3: memref<256x256xf32, #tpu.memory_space<vmem>>, %arg4: memref<256x256xf32, #tpu.memory_space<vmem>>, %arg5: memref<38x256xf32, #tpu.memory_space<vmem>>, %arg6: memref<38x256xf32, #tpu.memory_space<vmem>>) attributes {dimension_semantics = [#tpu.dimension_semantics<arbitrary>], iteration_bounds = array<i64: 1>, scalar_prefetch = 0 : i64, scratch_operands = 0 : i64, tpu.core_type = #tpu.core_type<tc>, window_params = [{pipeline_mode = #tpu.pipeline_mode<synchronous>, transform_indices = @transform_0, window_bounds = array<i64: 38, 256>}, {pipeline_mode = #tpu.pipeline_mode<synchronous>, transform_indices = @transform_1, window_bounds = array<i64: 38, 256>}, {pipeline_mode = #tpu.pipeline_mode<synchronous>, transform_indices = @transform_2, window_bounds = array<i64: 256, 256>}, {pipeline_mode = #tpu.pipeline_mode<synchronous>, transform_indices = @transform_3, window_bounds = array<i64: 256, 256>}, {pipeline_mode = #tpu.pipeline_mode<synchronous>, transform_indices = @transform_4, window_bounds = array<i64: 38, 256>}, {pipeline_mode = #tpu.pipeline_mode<synchronous>, transform_indices = @transform_5, window_bounds = array<i64: 38, 256>}]} {
    %c0 = arith.constant 0 : index
    %c0_0 = arith.constant 0 : index
    %0 = vector.load %arg1[%c0, %c0_0] : memref<38x256xf32, #tpu.memory_space<vmem>>, vector<38x256xf32>
    %c0_1 = arith.constant 0 : index
    %c0_2 = arith.constant 0 : index
    %1 = vector.load %arg2[%c0_1, %c0_2] : memref<38x256xf32, #tpu.memory_space<vmem>>, vector<38x256xf32>
    %c0_3 = arith.constant 0 : index
    %c0_4 = arith.constant 0 : index
    %2 = vector.load %arg3[%c0_3, %c0_4] : memref<256x256xf32, #tpu.memory_space<vmem>>, vector<256x256xf32>
    %c0_5 = arith.constant 0 : index
    %c0_6 = arith.constant 0 : index
    %3 = vector.load %arg4[%c0_5, %c0_6] : memref<256x256xf32, #tpu.memory_space<vmem>>, vector<256x256xf32>
    %cst = arith.constant dense<0.000000e+00> : vector<38x256xf32>
    %4 = tpu.matmul %0, %2, %cst {dimension_numbers = #tpu.dot_dimension_numbers<[1], [0], [0], [1], [0, 0, 1, 1], [], []>} : vector<38x256xf32>, vector<256x256xf32>, vector<38x256xf32> -> vector<38x256xf32>
    %cst_7 = arith.constant dense<0.000000e+00> : vector<38x256xf32>
    %5 = tpu.matmul %1, %3, %cst_7 {dimension_numbers = #tpu.dot_dimension_numbers<[1], [0], [0], [1], [0, 0, 1, 1], [], []>} : vector<38x256xf32>, vector<256x256xf32>, vector<38x256xf32> -> vector<38x256xf32>
    %6 = arith.subf %4, %5 : vector<38x256xf32>
    %c0_8 = arith.constant 0 : index
    %c0_9 = arith.constant 0 : index
    %7 = vector.load %arg5[%c0_8, %c0_9] : memref<38x256xf32, #tpu.memory_space<vmem>>, vector<38x256xf32>
    tpu.vector_store %arg5[%c0_8, %c0_9], %6 {strides = array<i32>} : memref<38x256xf32, #tpu.memory_space<vmem>>, vector<38x256xf32>,
    %cst_10 = arith.constant dense<0.000000e+00> : vector<38x256xf32>
    %8 = tpu.matmul %0, %3, %cst_10 {dimension_numbers = #tpu.dot_dimension_numbers<[1], [0], [0], [1], [0, 0, 1, 1], [], []>} : vector<38x256xf32>, vector<256x256xf32>, vector<38x256xf32> -> vector<38x256xf32>
    %cst_11 = arith.constant dense<0.000000e+00> : vector<38x256xf32>
    %9 = tpu.matmul %1, %2, %cst_11 {dimension_numbers = #tpu.dot_dimension_numbers<[1], [0], [0], [1], [0, 0, 1, 1], [], []>} : vector<38x256xf32>, vector<256x256xf32>, vector<38x256xf32> -> vector<38x256xf32>
    %10 = arith.addf %8, %9 : vector<38x256xf32>
    %c0_12 = arith.constant 0 : index
    %c0_13 = arith.constant 0 : index
    %11 = vector.load %arg6[%c0_12, %c0_13] : memref<38x256xf32, #tpu.memory_space<vmem>>, vector<38x256xf32>
    tpu.vector_store %arg6[%c0_12, %c0_13], %10 {strides = array<i32>} : memref<38x256xf32, #tpu.memory_space<vmem>>, vector<38x256xf32>,
    return
  }
  func.func @transform_0(%arg0: i32) -> (i32, i32) {
    %c0_i32 = arith.constant 0 : i32
    %c0_i32_0 = arith.constant 0 : i32
    %c0_i32_1 = arith.constant 0 : i32
    return %c0_i32, %c0_i32_0 : i32, i32
  }
  func.func @transform_1(%arg0: i32) -> (i32, i32) {
    %c0_i32 = arith.constant 0 : i32
    %c0_i32_0 = arith.constant 0 : i32
    %c0_i32_1 = arith.constant 0 : i32
    return %c0_i32, %c0_i32_0 : i32, i32
  }
  func.func @transform_2(%arg0: i32) -> (i32, i32) {
    %c0_i32 = arith.constant 0 : i32
    %c0_i32_0 = arith.constant 0 : i32
    %c0_i32_1 = arith.constant 0 : i32
    return %c0_i32, %c0_i32_0 : i32, i32
  }
  func.func @transform_3(%arg0: i32) -> (i32, i32) {
    %c0_i32 = arith.constant 0 : i32
    %c0_i32_0 = arith.constant 0 : i32
    %c0_i32_1 = arith.constant 0 : i32
    return %c0_i32, %c0_i32_0 : i32, i32
  }
  func.func @transform_4(%arg0: i32) -> (i32, i32) {
    %c0_i32 = arith.constant 0 : i32
    %c0_i32_0 = arith.constant 0 : i32
    %c0_i32_1 = arith.constant 0 : i32
    return %c0_i32, %c0_i32_0 : i32, i32
  }
  func.func @transform_5(%arg0: i32) -> (i32, i32) {
    %c0_i32 = arith.constant 0 : i32
    %c0_i32_0 = arith.constant 0 : i32
    %c0_i32_1 = arith.constant 0 : i32
    return %c0_i32, %c0_i32_0 : i32, i32
  }
}

</mosaic_0001>

<bundles_post_ra>
// kernel: tpu_custom_call.1
= control target key start
LH: loop header
LB: loop body
LE: loop exit
PB: predicated region body
PF: predicated region fallthrough
CT: control target
= control target key end

     0   :  { %11 = vsyncpa [#allocation3], 0  ;;  %s1317_s0 = inlined_call_operand.hbm [shape: f32[38,256], index: 0, kind: input, shape index: {}]   ;;  %s1318_s1 = inlined_call_operand.hbm [shape: f32[38,256], index: 1, kind: input, shape index: {}]   ;;  %s1319_s2 = inlined_call_operand.hbm [shape: f32[256,256], index: 2, kind: input, shape index: {}]   ;;  %s1320_s3 = inlined_call_operand.hbm [shape: f32[256,256], index: 3, kind: input, shape index: {}]   ;;  %s1321_s4 = inlined_call_operand.hbm [shape: f32[38,256], index: 4, kind: output, shape index: {0}]   ;;  %s1322_s5 = inlined_call_operand.hbm [shape: f32[38,256], index: 5, kind: output, shape index: {1}]  }
   0x1   :  { %12 = vsyncpa [#allocation6], 0 }
   0x2   :  { %13 = vsyncpa [#allocation9], 0 }
   0x3   :  { %14 = vsyncpa [#allocation4], 0 }
   0x4   :  { %15 = vsyncpa [#allocation12], 0  ;;  %s1085_s18 = smov [#allocation5]   ;;  %s1086_s20 = smov [#allocation2]  }
   0x5   :  { %s33_s19 = sshll.u32 %s1085_s18, 4  ;;  %s21_s21 = sshll.u32 %s1086_s20, 4  ;;  %s34_s19 = int_to_ptr.vmem [resolvable:$true] %s33_s19  ;;  %s1123_s21 = int_to_ptr.vmem [resolvable:$true] %s21_s21 }
   0x6   :  { %s943_s24 = scalar_lea.hbm %s1318_s1, 1280 }
   0x7   :  { %p944_p0 = scmp.ne.s32.totalorder %s1318_s1, %s943_s24  ;;  %p947_p1 = scmp.lt.u32.totalorder %s943_s24, %s1318_s1 }
   0x9   :  { %p949_p2 = pnand %p947_p1, %p944_p0 }
   0xb   :  { %952 = shalt.err (!%p949_p2)
}
   0xc   :  { %s953_s29 = scalar_lea.vmem %s34_s19, 1280  ;;  %p958_p4 = scmp.lt.s32.totalorder %s34_s19, %s34_s19 }
   0xd   :  { %p954_p3 = scmp.ne.s32.totalorder %s34_s19, %s953_s29  ;;  %p959_p5 = scmp.lt.s32.totalorder %s953_s29, %s953_s29 }
   0xf   :  { %p960_p6 = por %p959_p5, %p958_p4 }
  0x11   :  { %p961_p7 = pnand %p960_p6, %p954_p3 }
  0x13   :  { %964 = shalt.err (!%p961_p7)
}
  0x14   :  { %s1087_s30 = smov 256   ;;  %s1088_s6 = smov 16  }
  0x15   :  { %39 = dma.hbm_to_vmem [thread:$0]  %s1318_s1, 1280, %s34_s19, [#allocation6], %s1087_s30, %s1087_s30, %s1088_s6  }
  0x16   :  { %s965_s11 = scalar_lea.hbm %s1317_s0, 1280 }
  0x17   :  { %p966_p8 = scmp.ne.s32.totalorder %s1317_s0, %s965_s11  ;;  %p969_p9 = scmp.lt.u32.totalorder %s965_s11, %s1317_s0 }
  0x19   :  { %p971_p10 = pnand %p969_p9, %p966_p8 }
  0x1b   :  { %974 = shalt.err (!%p971_p10)
}
  0x1c   :  { %s975_s16 = scalar_lea.vmem %s1123_s21, 1280  ;;  %p980_p12 = scmp.lt.s32.totalorder %s1123_s21, %s1123_s21 }
  0x1d   :  { %p976_p11 = scmp.ne.s32.totalorder %s1123_s21, %s975_s16  ;;  %p981_p13 = scmp.lt.s32.totalorder %s975_s16, %s975_s16 }
  0x1f   :  { %p982_p0 = por %p981_p13, %p980_p12 }
  0x21   :  { %p983_p1 = pnand %p982_p0, %p976_p11 }
  0x23   :  { %986 = shalt.err (!%p983_p1)
}
  0x24   :  { %27 = dma.hbm_to_vmem [thread:$0]  %s1317_s0, 1280, %s1123_s21, [#allocation3], %s1087_s30, %s1087_s30, %s1088_s6  }
  0x25   :  { %s1089_s18 = smov [#allocation7]   ;;  %s1090_s20 = smov [#allocation8]  }
  0x26   :  { %s45_s19 = sshll.u32 %s1089_s18, 4  ;;  %s57_s22 = sshll.u32 %s1090_s20, 4  ;;  %s46_s19 = int_to_ptr.vmem [resolvable:$true] %s45_s19  ;;  %s1160_s22 = int_to_ptr.vmem [resolvable:$true] %s57_s22 }
  0x27   :  { %s987_s25 = scalar_lea.hbm %s1319_s2, 8192 }
  0x28   :  { %p988_p2 = scmp.ne.s32.totalorder %s1319_s2, %s987_s25  ;;  %p991_p3 = scmp.lt.u32.totalorder %s987_s25, %s1319_s2 }
  0x2a   :  { %p993_p4 = pnand %p991_p3, %p988_p2 }
  0x2c   :  { %996 = shalt.err (!%p993_p4)
}
  0x2d   :  { %s997_s0 = scalar_lea.vmem %s46_s19, 8192  ;;  %p1002_p6 = scmp.lt.s32.totalorder %s46_s19, %s46_s19 }
  0x2e   :  { %p998_p5 = scmp.ne.s32.totalorder %s46_s19, %s997_s0  ;;  %p1003_p7 = scmp.lt.s32.totalorder %s997_s0, %s997_s0 }
  0x30   :  { %p1004_p8 = por %p1003_p7, %p1002_p6 }
  0x32   :  { %p1005_p9 = pnand %p1004_p8, %p998_p5 }
  0x34   :  { %1008 = shalt.err (!%p1005_p9)
}
  0x35   :  { %51 = dma.hbm_to_vmem [thread:$0]  %s1319_s2, 8192, %s46_s19, [#allocation6], %s1087_s30, %s1087_s30, %s1088_s6  }
  0x36   :  { %s1009_s10 = scalar_lea.hbm %s1320_s3, 8192 }
  0x37   :  { %p1010_p10 = scmp.ne.s32.totalorder %s1320_s3, %s1009_s10  ;;  %p1013_p11 = scmp.lt.u32.totalorder %s1009_s10, %s1320_s3 }
  0x39   :  { %p1015_p12 = pnand %p1013_p11, %p1010_p10 }
  0x3b   :  { %1018 = shalt.err (!%p1015_p12)
}
  0x3c   :  { %s1019_s15 = scalar_lea.vmem %s1160_s22, 8192  ;;  %p1024_p0 = scmp.lt.s32.totalorder %s1160_s22, %s1160_s22 }
  0x3d   :  { %p1020_p13 = scmp.ne.s32.totalorder %s1160_s22, %s1019_s15  ;;  %p1025_p1 = scmp.lt.s32.totalorder %s1019_s15, %s1019_s15 }
  0x3f   :  { %p1026_p2 = por %p1025_p1, %p1024_p0 }
  0x41   :  { %p1027_p3 = pnand %p1026_p2, %p1020_p13 }
  0x43   :  { %1030 = shalt.err (!%p1027_p3)
}
  0x44   :  { %63 = dma.hbm_to_vmem [thread:$0]  %s1320_s3, 8192, %s1160_s22, [#allocation9], %s1087_s30, %s1087_s30, %s1088_s6  }
  0x45   :  { %1075 = dma.done.wait [#allocation3], 1280  }
  0x46   :  { %1076 = vsyncadd [#allocation3], 4294966016 }
  0x47   :  { %1077 = dma.done.wait [#allocation6], 9472  }
  0x48   :  { %1078 = vsyncadd [#allocation6], 4294957824 }
  0x49   :  { %1079 = dma.done.wait [#allocation9], 8192  }
  0x4a   :  { %1080 = vsyncadd [#allocation9], 4294959104  ;;  %v97_v0 = vld [vmem:[#allocation7 + $0x8] sm:$0xff]  ;;  %v99_v1 = vld [vmem:[#allocation7 + $0x18] sm:$0xff]  ;;  %s1091_s3 = smov [#allocation11]   ;;  %s1092_s17 = smov [#allocation10]  }
  0x4b   :  { %v96_v2 = vld [vmem:[#allocation7] sm:$0xff]  ;;  %v669_v3 = vpack.c.bf16 %v99_v1, %v97_v0  ;;  %v98_v4 = vld [vmem:[#allocation7 + $0x10] sm:$0xff]  ;;  %v101_v5 = vld [vmem:[#allocation7 + $0x28] sm:$0xff]  ;;  %s651_s1 = sshll.u32 %s1091_s3, 4  ;;  %s639_s18 = sshll.u32 %s1092_s17, 4  ;;  %s652_s1 = int_to_ptr.vmem [resolvable:$true] %s651_s1  ;;  %s1280_s18 = int_to_ptr.vmem [resolvable:$true] %s639_s18 }
  0x4c   :  { %v103_v6 = vld [vmem:[#allocation7 + $0x38] sm:$0xff]  ;;  %v671_v7 = vpack.c.bf16 %v98_v4, %v96_v2  ;;  %v100_v9 = vld [vmem:[#allocation7 + $0x20] sm:$0xff]  ;;  %v102_v10 = vld [vmem:[#allocation7 + $0x30] sm:$0xff]  ;;  %s1031_s19 = scalar_lea.vmem %s652_s1, 1280  ;;  %p1036_p5 = scmp.lt.s32.totalorder %s652_s1, %s652_s1 }
  0x4d   :  { %v673_v8 = vpack.c.bf16 %v103_v6, %v101_v5  ;;  %v105_v11 = vld [vmem:[#allocation7 + $0x48] sm:$0xff]  ;;  %670 = vmatprep.subr.bf16.mxu1 %v669_v3  ;;  %798 = vmatprep.subr.bf16.mxu0 %v669_v3  ;;  %v107_v12 = vld [vmem:[#allocation7 + $0x58] sm:$0xff]  ;;  %v675_v13 = vpack.c.bf16 %v102_v10, %v100_v9  ;;  %v104_v15 = vld [vmem:[#allocation7 + $0x40] sm:$0xff]  ;;  %p1032_p4 = scmp.ne.s32.totalorder %s652_s1, %s1031_s19  ;;  %p1037_p6 = scmp.lt.s32.totalorder %s1031_s19, %s1031_s19 }
  0x4e   :  { %672 = vmatpush1.bf16.msra.mxu1 %v671_v7  ;;  %800 = vmatpush1.bf16.msra.mxu0 %v671_v7  ;;  %v677_v14 = vpack.c.bf16 %v107_v12, %v105_v11  ;;  %v106_v16 = vld [vmem:[#allocation7 + $0x50] sm:$0xff]  ;;  %v109_v17 = vld [vmem:[#allocation7 + $0x68] sm:$0xff]  ;;  %v111_v18 = vld [vmem:[#allocation7 + $0x78] sm:$0xff] }
  0x4f   :  { %674 = vmatprep.subr.bf16.mxu1 %v673_v8  ;;  %802 = vmatprep.subr.bf16.mxu0 %v673_v8  ;;  %v679_v19 = vpack.c.bf16 %v106_v16, %v104_v15  ;;  %v681_v20 = vpack.c.bf16 %v111_v18, %v109_v17  ;;  %v108_v21 = vld [vmem:[#allocation7 + $0x60] sm:$0xff]  ;;  %v110_v22 = vld [vmem:[#allocation7 + $0x70] sm:$0xff]  ;;  %v113_v23 = vld [vmem:[#allocation7 + $0x88] sm:$0xff]  ;;  %p1038_p7 = por %p1037_p6, %p1036_p5 }
  0x50   :  { %v115_v24 = vld [vmem:[#allocation7 + $0x98] sm:$0xff]  ;;  %v683_v25 = vpack.c.bf16 %v110_v22, %v108_v21  ;;  %v112_v27 = vld [vmem:[#allocation7 + $0x80] sm:$0xff]  ;;  %v114_v28 = vld [vmem:[#allocation7 + $0x90] sm:$0xff] }
  0x51   :  { %v685_v26 = vpack.c.bf16 %v115_v24, %v113_v23  ;;  %v117_v29 = vld [vmem:[#allocation7 + $0xa8] sm:$0xff]  ;;  %v119_v30 = vld [vmem:[#allocation7 + $0xb8] sm:$0xff]  ;;  %v687_v31 = vpack.c.bf16 %v114_v28, %v112_v27  ;;  %v116_v33 = vld [vmem:[#allocation7 + $0xa0] sm:$0xff]  ;;  %p1039_p8 = pnand %p1038_p7, %p1032_p4 }
  0x52   :  { %676 = vmatpush1.bf16.msra.mxu1 %v675_v13  ;;  %804 = vmatpush1.bf16.msra.mxu0 %v675_v13  ;;  %v689_v32 = vpack.c.bf16 %v119_v30, %v117_v29  ;;  %v118_v34 = vld [vmem:[#allocation7 + $0xb0] sm:$0xff]  ;;  %v121_v35 = vld [vmem:[#allocation7 + $0xc8] sm:$0xff]  ;;  %v123_v36 = vld [vmem:[#allocation7 + $0xd8] sm:$0xff] }
  0x53   :  { %678 = vmatprep.subr.bf16.mxu1 %v677_v14  ;;  %806 = vmatprep.subr.bf16.mxu0 %v677_v14  ;;  %v691_v37 = vpack.c.bf16 %v118_v34, %v116_v33  ;;  %v693_v38 = vpack.c.bf16 %v123_v36, %v121_v35  ;;  %v120_v39 = vld [vmem:[#allocation7 + $0xc0] sm:$0xff]  ;;  %v122_v40 = vld [vmem:[#allocation7 + $0xd0] sm:$0xff]  ;;  %v1197_v41 = vld [vmem:[#allocation2 + $0x8] sm:$0xff] }
  0x54   :  { %v125_v42 = vld [vmem:[#allocation7 + $0xe8] sm:$0xff]  ;;  %v127_v43 = vld [vmem:[#allocation7 + $0xf8] sm:$0xff]  ;;  %288 = vmatprep.mubr.f32.mxu1 %v1197_v41  ;;  %v695_v45 = vpack.c.bf16 %v122_v40, %v120_v39  ;;  %v124_v47 = vld [vmem:[#allocation7 + $0xe0] sm:$0xff] }
  0x55   :  { %v1200_v44 = vld [vmem:[#allocation5 + $0x8] sm:$0xff]  ;;  %v697_v46 = vpack.c.bf16 %v127_v43, %v125_v42  ;;  %v126_v48 = vld [vmem:[#allocation7 + $0xf0] sm:$0xff]  ;;  %v129_v49 = vld [vmem:[#allocation7 + $0x108] sm:$0xff] }
  0x56   :  { %680 = vmatpush1.bf16.msra.mxu1 %v679_v19  ;;  %808 = vmatpush1.bf16.msra.mxu0 %v679_v19  ;;  %v131_v50 = vld [vmem:[#allocation7 + $0x118] sm:$0xff]  ;;  %v699_v51 = vpack.c.bf16 %v126_v48, %v124_v47  ;;  %v128_v53 = vld [vmem:[#allocation7 + $0x100] sm:$0xff]  ;;  %v130_v54 = vld [vmem:[#allocation7 + $0x110] sm:$0xff] }
  0x57   :  { %682 = vmatprep.subr.bf16.mxu1 %v681_v20  ;;  %810 = vmatprep.subr.bf16.mxu0 %v681_v20  ;;  %v701_v52 = vpack.c.bf16 %v131_v50, %v129_v49  ;;  %v133_v55 = vld [vmem:[#allocation7 + $0x128] sm:$0xff]  ;;  %v135_v56 = vld [vmem:[#allocation7 + $0x138] sm:$0xff]  ;;  %v703_v57 = vpack.c.bf16 %v130_v54, %v128_v53  ;;  %v132_v59 = vld [vmem:[#allocation7 + $0x120] sm:$0xff] }
  0x58   :  { %498 = vmatprep.mubr.f32.mxu0 %v1200_v44  ;;  %v705_v58 = vpack.c.bf16 %v135_v56, %v133_v55  ;;  %v134_v60 = vld [vmem:[#allocation7 + $0x130] sm:$0xff]  ;;  %v137_v61 = vld [vmem:[#allocation7 + $0x148] sm:$0xff]  ;;  %v139_v62 = vld [vmem:[#allocation7 + $0x158] sm:$0xff] }
  0x59   :  { %v707_v63 = vpack.c.bf16 %v134_v60, %v132_v59  ;;  %v709_v0 = vpack.c.bf16 %v139_v62, %v137_v61  ;;  %v136_v1 = vld [vmem:[#allocation7 + $0x140] sm:$0xff]  ;;  %v138_v2 = vld [vmem:[#allocation7 + $0x150] sm:$0xff]  ;;  %v141_v3 = vld [vmem:[#allocation7 + $0x168] sm:$0xff] }
  0x5a   :  { %684 = vmatpush1.bf16.msra.mxu1 %v683_v25  ;;  %812 = vmatpush1.bf16.msra.mxu0 %v683_v25  ;;  %v143_v4 = vld [vmem:[#allocation7 + $0x178] sm:$0xff]  ;;  %v711_v5 = vpack.c.bf16 %v138_v2, %v136_v1  ;;  %v140_v7 = vld [vmem:[#allocation7 + $0x160] sm:$0xff]  ;;  %v142_v8 = vld [vmem:[#allocation7 + $0x170] sm:$0xff] }
  0x5b   :  { %686 = vmatprep.subr.bf16.mxu1 %v685_v26  ;;  %814 = vmatprep.subr.bf16.mxu0 %v685_v26  ;;  %v713_v6 = vpack.c.bf16 %v143_v4, %v141_v3  ;;  %v145_v9 = vld [vmem:[#allocation7 + $0x188] sm:$0xff]  ;;  %v147_v10 = vld [vmem:[#allocation7 + $0x198] sm:$0xff]  ;;  %v715_v11 = vpack.c.bf16 %v142_v8, %v140_v7  ;;  %v144_v13 = vld [vmem:[#allocation7 + $0x180] sm:$0xff] }
  0x5c   :  { %v717_v12 = vpack.c.bf16 %v147_v10, %v145_v9  ;;  %v146_v14 = vld [vmem:[#allocation7 + $0x190] sm:$0xff]  ;;  %v149_v15 = vld [vmem:[#allocation7 + $0x1a8] sm:$0xff]  ;;  %v151_v16 = vld [vmem:[#allocation7 + $0x1b8] sm:$0xff] }
  0x5d   :  { %v719_v17 = vpack.c.bf16 %v146_v14, %v144_v13  ;;  %v721_v18 = vpack.c.bf16 %v151_v16, %v149_v15  ;;  %v148_v19 = vld [vmem:[#allocation7 + $0x1a0] sm:$0xff]  ;;  %v150_v20 = vld [vmem:[#allocation7 + $0x1b0] sm:$0xff]  ;;  %v153_v21 = vld [vmem:[#allocation7 + $0x1c8] sm:$0xff] }
  0x5e   :  { %688 = vmatpush1.bf16.msra.mxu1 %v687_v31  ;;  %816 = vmatpush1.bf16.msra.mxu0 %v687_v31  ;;  %v155_v22 = vld [vmem:[#allocation7 + $0x1d8] sm:$0xff]  ;;  %v723_v23 = vpack.c.bf16 %v150_v20, %v148_v19  ;;  %v152_v25 = vld [vmem:[#allocation7 + $0x1c0] sm:$0xff]  ;;  %v154_v26 = vld [vmem:[#allocation7 + $0x1d0] sm:$0xff] }
  0x5f   :  { %690 = vmatprep.subr.bf16.mxu1 %v689_v32  ;;  %818 = vmatprep.subr.bf16.mxu0 %v689_v32  ;;  %v725_v24 = vpack.c.bf16 %v155_v22, %v153_v21  ;;  %v157_v27 = vld [vmem:[#allocation7 + $0x1e8] sm:$0xff]  ;;  %v159_v28 = vld [vmem:[#allocation7 + $0x1f8] sm:$0xff]  ;;  %v727_v29 = vpack.c.bf16 %v154_v26, %v152_v25  ;;  %v156_v31 = vld [vmem:[#allocation7 + $0x1e0] sm:$0xff] }
  0x60   :  { %v729_v30 = vpack.c.bf16 %v159_v28, %v157_v27  ;;  %v158_v32 = vld [vmem:[#allocation7 + $0x1f0] sm:$0xff]  ;;  %v161_v33 = vld [vmem:[#allocation8 + $0x8] sm:$0xff]  ;;  %v163_v34 = vld [vmem:[#allocation8 + $0x18] sm:$0xff] }
  0x61   :  { %v731_v35 = vpack.c.bf16 %v158_v32, %v156_v31  ;;  %v733_v36 = vpack.c.bf16 %v163_v34, %v161_v33  ;;  %v165_v39 = vld [vmem:[#allocation8 + $0x28] sm:$0xff]  ;;  %v167_v40 = vld [vmem:[#allocation8 + $0x38] sm:$0xff]  ;;  %v1203_v42 = vld [vmem:[#allocation2] sm:$0xff] }
  0x62   :  { %692 = vmatpush1.bf16.msra.mxu1 %v691_v37  ;;  %820 = vmatpush1.bf16.msra.mxu0 %v691_v37  ;;  %v160_v37 = vld [vmem:[#allocation8] sm:$0xff]  ;;  %v166_v48 = vld [vmem:[#allocation8 + $0x30] sm:$0xff]  ;;  %v169_v49 = vld [vmem:[#allocation8 + $0x48] sm:$0xff] }
  0x63   :  { %694 = vmatprep.subr.bf16.mxu1 %v693_v38  ;;  %822 = vmatprep.subr.bf16.mxu0 %v693_v38  ;;  %v162_v38 = vld [vmem:[#allocation8 + $0x10] sm:$0xff]  ;;  %v164_v47 = vld [vmem:[#allocation8 + $0x20] sm:$0xff]  ;;  %v171_v50 = vld [vmem:[#allocation8 + $0x58] sm:$0xff] }
  0x64   :  { %v735_v43 = vpack.c.bf16 %v162_v38, %v160_v37  ;;  %v739_v53 = vpack.c.bf16 %v166_v48, %v164_v47  ;;  %v1213_v54 = vld [vmem:[#allocation2 + $0x10] sm:$0xff]  ;;  %v1215_v55 = vld [vmem:[#allocation5 + $0x10] sm:$0xff]  ;;  %v741_v56 = vpack.c.bf16 %v171_v50, %v169_v49  ;;  %v173_v59 = vld [vmem:[#allocation8 + $0x68] sm:$0xff] }
  0x65   :  { %v175_v60 = vld [vmem:[#allocation8 + $0x78] sm:$0xff]  ;;  %v1221_v61 = vld [vmem:[#allocation2 + $0x28] sm:$0xff]  ;;  %v1227_v1 = vld [vmem:[#allocation5 + $0x20] sm:$0xff] }
  0x66   :  { %696 = vmatpush1.bf16.msra.mxu1 %v695_v45  ;;  %824 = vmatpush1.bf16.msra.mxu0 %v695_v45  ;;  %v1205_v45 = vld [vmem:[#allocation5] sm:$0xff]  ;;  %v1223_v62 = vld [vmem:[#allocation5 + $0x28] sm:$0xff]  ;;  %v745_v2 = vpack.c.bf16 %v175_v60, %v173_v59  ;;  %v172_v3 = vld [vmem:[#allocation8 + $0x60] sm:$0xff] }
  0x67   :  { %698 = vmatprep.subr.bf16.mxu1 %v697_v46  ;;  %826 = vmatprep.subr.bf16.mxu0 %v697_v46  ;;  %v737_v46 = vpack.c.bf16 %v167_v40, %v165_v39  ;;  %v174_v4 = vld [vmem:[#allocation8 + $0x70] sm:$0xff]  ;;  %v1233_v7 = vld [vmem:[#allocation2 + $0x38] sm:$0xff]  ;;  %v1235_v8 = vld [vmem:[#allocation5 + $0x38] sm:$0xff] }
  0x68   :  { %v747_v9 = vpack.c.bf16 %v174_v4, %v172_v3  ;;  %v1237_v10 = vld [vmem:[#allocation2 + $0x30] sm:$0xff]  ;;  %v176_v13 = vld [vmem:[#allocation8 + $0x80] sm:$0xff]  ;;  %v181_v15 = vld [vmem:[#allocation8 + $0xa8] sm:$0xff] }
  0x69   :  { %v178_v14 = vld [vmem:[#allocation8 + $0x90] sm:$0xff]  ;;  %v183_v16 = vld [vmem:[#allocation8 + $0xb8] sm:$0xff]  ;;  %v1249_v20 = vld [vmem:[#allocation2 + $0x40] sm:$0x3f] }
  0x6a   :  { %700 = vmatpush1.bf16.msra.mxu1 %v699_v51  ;;  %828 = vmatpush1.bf16.msra.mxu0 %v699_v51  ;;  %v1209_v51 = vld [vmem:[#allocation2 + $0x18] sm:$0xff]  ;;  %v751_v19 = vpack.c.bf16 %v178_v14, %v176_v13  ;;  %v1251_v21 = vld [vmem:[#allocation5 + $0x40] sm:$0x3f]  ;;  %v753_v22 = vpack.c.bf16 %v183_v16, %v181_v15  ;;  %v185_v25 = vld [vmem:[#allocation8 + $0xc8] sm:$0xff] }
  0x6b   :  { %702 = vmatprep.subr.bf16.mxu1 %v701_v52  ;;  %830 = vmatprep.subr.bf16.mxu0 %v701_v52  ;;  %v1211_v52 = vld [vmem:[#allocation5 + $0x18] sm:$0xff]  ;;  %v187_v26 = vld [vmem:[#allocation8 + $0xd8] sm:$0xff]  ;;  %v196_v49 = vld [vmem:[#allocation8 + $0x120] sm:$0xff] }
  0x6c   :  { %v757_v28 = vpack.c.bf16 %v187_v26, %v185_v25  ;;  %v189_v31 = vld [vmem:[#allocation8 + $0xe8] sm:$0xff]  ;;  %v191_v32 = vld [vmem:[#allocation8 + $0xf8] sm:$0xff]  ;;  %v198_v50 = vld [vmem:[#allocation8 + $0x130] sm:$0xff] }
  0x6d   :  { %v761_v34 = vpack.c.bf16 %v191_v32, %v189_v31  ;;  %v193_v37 = vld [vmem:[#allocation8 + $0x108] sm:$0xff]  ;;  %v195_v38 = vld [vmem:[#allocation8 + $0x118] sm:$0xff]  ;;  %v200_v59 = vld [vmem:[#allocation8 + $0x140] sm:$0xff] }
  0x6e   :  { %704 = vmatpush1.bf16.msra.mxu1 %v703_v57  ;;  %832 = vmatpush1.bf16.msra.mxu0 %v703_v57  ;;  %v168_v57 = vld [vmem:[#allocation8 + $0x40] sm:$0xff]  ;;  %v765_v40 = vpack.c.bf16 %v195_v38, %v193_v37  ;;  %v202_v60 = vld [vmem:[#allocation8 + $0x150] sm:$0xff] }
  0x6f   :  { %706 = vmatprep.subr.bf16.mxu1 %v705_v58  ;;  %834 = vmatprep.subr.bf16.mxu0 %v705_v58  ;;  %v170_v58 = vld [vmem:[#allocation8 + $0x50] sm:$0xff]  ;;  %v775_v3 = vpack.c.bf16 %v202_v60, %v200_v59  ;;  %v208_v15 = vld [vmem:[#allocation8 + $0x180] sm:$0xff] }
  0x70   :  { %v210_v16 = vld [vmem:[#allocation8 + $0x190] sm:$0xff]  ;;  %v212_v25 = vld [vmem:[#allocation8 + $0x1a0] sm:$0xff] }
  0x71   :  { %v214_v26 = vld [vmem:[#allocation8 + $0x1b0] sm:$0xff]  ;;  %v216_v31 = vld [vmem:[#allocation8 + $0x1c0] sm:$0xff] }
  0x72   :  { %708 = vmatpush1.bf16.msra.mxu1 %v707_v63  ;;  %836 = vmatpush1.bf16.msra.mxu0 %v707_v63  ;;  %v743_v63 = vpack.c.bf16 %v170_v58, %v168_v57  ;;  %v771_v57 = vpack.c.bf16 %v198_v50, %v196_v49  ;;  %v218_v32 = vld [vmem:[#allocation8 + $0x1d0] sm:$0xff]  ;;  %v220_v37 = vld [vmem:[#allocation8 + $0x1e0] sm:$0xff] }
  0x73   :  { %710 = vmatprep.subr.bf16.mxu1 %v709_v0  ;;  %838 = vmatprep.subr.bf16.mxu0 %v709_v0  ;;  %v1225_v0 = vld [vmem:[#allocation2 + $0x20] sm:$0xff]  ;;  %v222_v38 = vld [vmem:[#allocation8 + $0x1f0] sm:$0xff] }
  0x76   :  { %712 = vmatpush1.bf16.msra.mxu1 %v711_v5  ;;  %840 = vmatpush1.bf16.msra.mxu0 %v711_v5  ;;  %v177_v5 = vld [vmem:[#allocation8 + $0x88] sm:$0xff] }
  0x77   :  { %714 = vmatprep.subr.bf16.mxu1 %v713_v6  ;;  %842 = vmatprep.subr.bf16.mxu0 %v713_v6  ;;  %v179_v6 = vld [vmem:[#allocation8 + $0x98] sm:$0xff] }
  0x7a   :  { %716 = vmatpush1.bf16.msra.mxu1 %v715_v11  ;;  %844 = vmatpush1.bf16.msra.mxu0 %v715_v11  ;;  %v1239_v11 = vld [vmem:[#allocation5 + $0x30] sm:$0xff] }
  0x7b   :  { %718 = vmatprep.subr.bf16.mxu1 %v717_v12  ;;  %846 = vmatprep.subr.bf16.mxu0 %v717_v12  ;;  %v749_v12 = vpack.c.bf16 %v179_v6, %v177_v5  ;;  %v204_v5 = vld [vmem:[#allocation8 + $0x160] sm:$0xff]  ;;  %v206_v6 = vld [vmem:[#allocation8 + $0x170] sm:$0xff] }
  0x7c   :  { %v779_v13 = vpack.c.bf16 %v206_v6, %v204_v5 }
  0x7e   :  { %720 = vmatpush1.bf16.msra.mxu1 %v719_v17  ;;  %848 = vmatpush1.bf16.msra.mxu0 %v719_v17  ;;  %v1245_v17 = vld [vmem:[#allocation2 + $0x48] sm:$0x3f] }
  0x7f   :  { %722 = vmatprep.subr.bf16.mxu1 %v721_v18  ;;  %850 = vmatprep.subr.bf16.mxu0 %v721_v18  ;;  %v1247_v18 = vld [vmem:[#allocation5 + $0x48] sm:$0x3f] }
  0x82   :  { %724 = vmatpush1.bf16.msra.mxu1 %v723_v23  ;;  %852 = vmatpush1.bf16.msra.mxu0 %v723_v23  ;;  %v180_v23 = vld [vmem:[#allocation8 + $0xa0] sm:$0xff] }
  0x83   :  { %726 = vmatprep.subr.bf16.mxu1 %v725_v24  ;;  %854 = vmatprep.subr.bf16.mxu0 %v725_v24  ;;  %v182_v24 = vld [vmem:[#allocation8 + $0xb0] sm:$0xff] }
  0x84   :  { %v755_v27 = vpack.c.bf16 %v182_v24, %v180_v23  ;;  %v783_v23 = vpack.c.bf16 %v210_v16, %v208_v15 }
  0x86   :  { %728 = vmatpush1.bf16.msra.mxu1 %v727_v29  ;;  %856 = vmatpush1.bf16.msra.mxu0 %v727_v29  ;;  %v184_v29 = vld [vmem:[#allocation8 + $0xc0] sm:$0xff] }
  0x87   :  { %730 = vmatprep.subr.bf16.mxu1 %v729_v30  ;;  %858 = vmatprep.subr.bf16.mxu0 %v729_v30  ;;  %v186_v30 = vld [vmem:[#allocation8 + $0xd0] sm:$0xff] }
  0x88   :  { %v759_v33 = vpack.c.bf16 %v186_v30, %v184_v29  ;;  %v787_v29 = vpack.c.bf16 %v214_v26, %v212_v25 }
  0x8a   :  { %732 = vmatpush1.bf16.msra.mxu1 %v731_v35  ;;  %860 = vmatpush1.bf16.msra.mxu0 %v731_v35  ;;  %v188_v35 = vld [vmem:[#allocation8 + $0xe0] sm:$0xff] }
  0x8b   :  { %734 = vmatprep.subr.bf16.mxu1 %v733_v36  ;;  %862 = vmatprep.subr.bf16.mxu0 %v733_v36  ;;  %v190_v36 = vld [vmem:[#allocation8 + $0xf0] sm:$0xff] }
  0x8c   :  { %v763_v39 = vpack.c.bf16 %v190_v36, %v188_v35  ;;  %v791_v35 = vpack.c.bf16 %v218_v32, %v216_v31 }
  0x8d   :  { %289 = vmatmul.mubr.f32.vlgmr.msra.gmra.mrb[0].mxu1 %v1203_v42  ;;  %499 = vmatmul.mubr.f32.vlgmr.msra.gmra.mrb[0].mxu0 %v1205_v45 }
  0x8e   :  { %736 = vmatpush1.bf16.msra.mxu1 %v735_v43  ;;  %864 = vmatpush1.bf16.msra.mxu0 %v735_v43  ;;  %v192_v43 = vld [vmem:[#allocation8 + $0x100] sm:$0xff] }
  0x8f   :  { %738 = vmatprep.subr.bf16.mxu1 %v737_v46  ;;  %866 = vmatprep.subr.bf16.mxu0 %v737_v46  ;;  %v197_v46 = vld [vmem:[#allocation8 + $0x128] sm:$0xff] }
  0x90   :  { %294 = vmatprep.mubr.f32.mxu1 %v1209_v51  ;;  %504 = vmatprep.mubr.f32.mxu0 %v1211_v52 }
  0x91   :  { %295 = vmatmul.mubr.f32.gmra.mrb[2].mxu1 %v1213_v54  ;;  %505 = vmatmul.mubr.f32.gmra.mrb[2].mxu0 %v1215_v55 }
  0x92   :  { %740 = vmatpush1.bf16.msra.mxu1 %v739_v53  ;;  %868 = vmatpush1.bf16.msra.mxu0 %v739_v53  ;;  %v201_v53 = vld [vmem:[#allocation8 + $0x148] sm:$0xff] }
  0x93   :  { %742 = vmatprep.subr.bf16.mxu1 %v741_v56  ;;  %870 = vmatprep.subr.bf16.mxu0 %v741_v56  ;;  %v203_v56 = vld [vmem:[#allocation8 + $0x158] sm:$0xff] }
  0x94   :  { %300 = vmatprep.mubr.f32.mxu1 %v1221_v61  ;;  %510 = vmatprep.mubr.f32.mxu0 %v1223_v62  ;;  %v773_v58 = vpack.c.bf16 %v203_v56, %v201_v53 }
  0x95   :  { %301 = vmatmul.mubr.f32.gmra.mrb[4].mxu1 %v1225_v0  ;;  %511 = vmatmul.mubr.f32.gmra.mrb[4].mxu0 %v1227_v1 }
  0x96   :  { %744 = vmatpush1.bf16.msra.mxu1 %v743_v63  ;;  %872 = vmatpush1.bf16.msra.mxu0 %v743_v63  ;;  %v205_v63 = vld [vmem:[#allocation8 + $0x168] sm:$0xff] }
  0x97   :  { %746 = vmatprep.subr.bf16.mxu1 %v745_v2  ;;  %874 = vmatprep.subr.bf16.mxu0 %v745_v2  ;;  %v207_v2 = vld [vmem:[#allocation8 + $0x178] sm:$0xff] }
  0x98   :  { %306 = vmatprep.mubr.f32.mxu1 %v1233_v7  ;;  %516 = vmatprep.mubr.f32.mxu0 %v1235_v8  ;;  %v777_v4 = vpack.c.bf16 %v207_v2, %v205_v63 }
  0x99   :  { %307 = vmatmul.mubr.f32.gmra.mrb[6].mxu1 %v1237_v10  ;;  %517 = vmatmul.mubr.f32.gmra.mrb[6].mxu0 %v1239_v11 }
  0x9a   :  { %748 = vmatpush1.bf16.msra.mxu1 %v747_v9  ;;  %876 = vmatpush1.bf16.msra.mxu0 %v747_v9  ;;  %v209_v9 = vld [vmem:[#allocation8 + $0x188] sm:$0xff] }
  0x9b   :  { %750 = vmatprep.subr.bf16.mxu1 %v749_v12  ;;  %878 = vmatprep.subr.bf16.mxu0 %v749_v12  ;;  %v211_v12 = vld [vmem:[#allocation8 + $0x198] sm:$0xff] }
  0x9c   :  { %312 = vmatprep.mubr.f32.mxu1 %v1245_v17  ;;  %522 = vmatprep.mubr.f32.mxu0 %v1247_v18  ;;  %v781_v14 = vpack.c.bf16 %v211_v12, %v209_v9 }
  0x9d   :  { %313 = vmatmul.mubr.f32.gmra.mrb[8].mxu1 %v1249_v20  ;;  %523 = vmatmul.mubr.f32.gmra.mrb[8].mxu0 %v1251_v21 }
  0x9e   :  { %752 = vmatpush1.bf16.msra.mxu1 %v751_v19  ;;  %880 = vmatpush1.bf16.msra.mxu0 %v751_v19  ;;  %v213_v19 = vld [vmem:[#allocation8 + $0x1a8] sm:$0xff] }
  0x9f   :  { %754 = vmatprep.subr.bf16.mxu1 %v753_v22  ;;  %882 = vmatprep.subr.bf16.mxu0 %v753_v22  ;;  %v215_v22 = vld [vmem:[#allocation8 + $0x1b8] sm:$0xff] }
  0xa0   :  { %383 = vmatprep.mubr.f32.mxu1 %v1200_v44  ;;  %593 = vmatprep.mubr.f32.mxu0 %v1197_v41  ;;  %v194_v44 = vld [vmem:[#allocation8 + $0x110] sm:$0xff]  ;;  %v199_v41 = vld [vmem:[#allocation8 + $0x138] sm:$0xff]  ;;  %v785_v24 = vpack.c.bf16 %v215_v22, %v213_v19 }
  0xa1   :  { %v767_v47 = vpack.c.bf16 %v194_v44, %v192_v43  ;;  %v769_v48 = vpack.c.bf16 %v199_v41, %v197_v46 }
  0xa2   :  { %756 = vmatpush1.bf16.msra.mxu1 %v755_v27  ;;  %884 = vmatpush1.bf16.msra.mxu0 %v755_v27  ;;  %v217_v27 = vld [vmem:[#allocation8 + $0x1c8] sm:$0xff] }
  0xa3   :  { %758 = vmatprep.subr.bf16.mxu1 %v757_v28  ;;  %886 = vmatprep.subr.bf16.mxu0 %v757_v28  ;;  %v219_v28 = vld [vmem:[#allocation8 + $0x1d8] sm:$0xff] }
  0xa4   :  { %v789_v30 = vpack.c.bf16 %v219_v28, %v217_v27 }
  0xa6   :  { %760 = vmatpush1.bf16.msra.mxu1 %v759_v33  ;;  %888 = vmatpush1.bf16.msra.mxu0 %v759_v33  ;;  %v221_v33 = vld [vmem:[#allocation8 + $0x1e8] sm:$0xff] }
  0xa7   :  { %762 = vmatprep.subr.bf16.mxu1 %v761_v34  ;;  %890 = vmatprep.subr.bf16.mxu0 %v761_v34  ;;  %v223_v34 = vld [vmem:[#allocation8 + $0x1f8] sm:$0xff] }
  0xa8   :  { %v793_v36 = vpack.c.bf16 %v223_v34, %v221_v33 }
  0xaa   :  { %764 = vmatpush1.bf16.msra.mxu1 %v763_v39  ;;  %892 = vmatpush1.bf16.msra.mxu0 %v763_v39  ;;  %v795_v39 = vpack.c.bf16 %v222_v38, %v220_v37 }
  0xab   :  { %766 = vmatprep.subr.bf16.mxu1 %v765_v40  ;;  %894 = vmatprep.subr.bf16.mxu0 %v765_v40 }
  0xae   :  { %768 = vmatpush1.bf16.msra.mxu1 %v767_v47  ;;  %896 = vmatpush1.bf16.msra.mxu0 %v767_v47 }
  0xaf   :  { %770 = vmatprep.subr.bf16.mxu1 %v769_v48  ;;  %898 = vmatprep.subr.bf16.mxu0 %v769_v48 }
  0xb2   :  { %772 = vmatpush1.bf16.msra.mxu1 %v771_v57  ;;  %900 = vmatpush1.bf16.msra.mxu0 %v771_v57 }
  0xb3   :  { %774 = vmatprep.subr.bf16.mxu1 %v773_v58  ;;  %902 = vmatprep.subr.bf16.mxu0 %v773_v58 }
  0xb6   :  { %776 = vmatpush1.bf16.msra.mxu1 %v775_v3  ;;  %904 = vmatpush1.bf16.msra.mxu0 %v775_v3 }
  0xb7   :  { %778 = vmatprep.subr.bf16.mxu1 %v777_v4  ;;  %906 = vmatprep.subr.bf16.mxu0 %v777_v4 }
  0xba   :  { %780 = vmatpush1.bf16.msra.mxu1 %v779_v13  ;;  %908 = vmatpush1.bf16.msra.mxu0 %v779_v13 }
  0xbb   :  { %782 = vmatprep.subr.bf16.mxu1 %v781_v14  ;;  %910 = vmatprep.subr.bf16.mxu0 %v781_v14 }
  0xbe   :  { %784 = vmatpush1.bf16.msra.mxu1 %v783_v23  ;;  %912 = vmatpush1.bf16.msra.mxu0 %v783_v23 }
  0xbf   :  { %786 = vmatprep.subr.bf16.mxu1 %v785_v24  ;;  %914 = vmatprep.subr.bf16.mxu0 %v785_v24 }
  0xc2   :  { %788 = vmatpush1.bf16.msra.mxu1 %v787_v29  ;;  %916 = vmatpush1.bf16.msra.mxu0 %v787_v29 }
  0xc3   :  { %790 = vmatprep.subr.bf16.mxu1 %v789_v30  ;;  %918 = vmatprep.subr.bf16.mxu0 %v789_v30 }
  0xc6   :  { %792 = vmatpush1.bf16.msra.mxu1 %v791_v35  ;;  %920 = vmatpush1.bf16.msra.mxu0 %v791_v35 }
  0xc7   :  { %794 = vmatprep.subr.bf16.mxu1 %v793_v36  ;;  %922 = vmatprep.subr.bf16.mxu0 %v793_v36 }
  0xca   :  { %796 = vmatpush1.bf16.msra.mxu1 %v795_v39  ;;  %924 = vmatpush1.bf16.msra.mxu0 %v795_v39 }
  0xcd   :  { %384 = vmatmul.mubr.f32.vlgmr.msra.gmra.mrb[10].mxu1 %v1205_v45  ;;  %594 = vmatmul.mubr.f32.vlgmr.msra.gmra.mrb[0].mxu0 %v1203_v42 }
  0xce   :  { %389 = vmatprep.mubr.f32.mxu1 %v1211_v52  ;;  %599 = vmatprep.mubr.f32.mxu0 %v1209_v51 }
  0xd1   :  { %390 = vmatmul.mubr.f32.gmra.mrb[12].mxu1 %v1215_v55  ;;  %600 = vmatmul.mubr.f32.gmra.mrb[2].mxu0 %v1213_v54 }
  0xd2   :  { %395 = vmatprep.mubr.f32.mxu1 %v1223_v62  ;;  %605 = vmatprep.mubr.f32.mxu0 %v1221_v61 }
  0xd5   :  { %396 = vmatmul.mubr.f32.gmra.mrb[14].mxu1 %v1227_v1  ;;  %606 = vmatmul.mubr.f32.gmra.mrb[4].mxu0 %v1225_v0 }
  0xd6   :  { %401 = vmatprep.mubr.f32.mxu1 %v1235_v8  ;;  %611 = vmatprep.mubr.f32.mxu0 %v1233_v7 }
  0xd9   :  { %402 = vmatmul.mubr.f32.gmra.mrb[16].mxu1 %v1239_v11  ;;  %612 = vmatmul.mubr.f32.gmra.mrb[6].mxu0 %v1237_v10 }
  0xda   :  { %407 = vmatprep.mubr.f32.mxu1 %v1247_v18  ;;  %617 = vmatprep.mubr.f32.mxu0 %v1245_v17 }
  0xdd   :  { %408 = vmatmul.mubr.f32.gmra.mrb[18].mxu1 %v1251_v21  ;;  %618 = vmatmul.mubr.f32.gmra.mrb[8].mxu0 %v1249_v20 }
 0x160   :  { %v290_v42 = vpop.f32.mrb[0].mxu1 }
 0x161   :  { %v292_v45 = vpop.f32.mrb[1].mxu1 }
 0x164   :  { %v296_v51 = vpop.f32.mrb[2].mxu1 }
 0x165   :  { %v298_v52 = vpop.f32.mrb[3].mxu1 }
 0x168   :  { %v302_v54 = vpop.f32.mrb[4].mxu1 }
 0x169   :  { %v304_v55 = vpop.f32.mrb[5].mxu1 }
 0x16c   :  { %v308_v61 = vpop.f32.mrb[6].mxu1 }
 0x16d   :  { %v310_v62 = vpop.f32.mrb[7].mxu1 }
 0x170   :  { %v314_v0 = vpop.f32.mrb[8].mxu1 }
 0x171   :  { %v1277_v1 = vpop.f32.mrb[9].mxu1 }
 0x1a0   :  { %v385_v7 = vpop.f32.mrb[10].mxu1  ;;  %v595_v8 = vpop.f32.mrb[0].mxu0 }
 0x1a1   :  { %v414_v10 = vsub.f32 %v290_v42, %v385_v7  ;;  %624 = vst [vmem:[#allocation11] sm:$0xff] %v595_v8  ;;  %v387_v11 = vpop.f32.mrb[11].mxu1  ;;  %v597_v17 = vpop.f32.mrb[1].mxu0 }
 0x1a2   :  { %v415_v18 = vsub.f32 %v292_v45, %v387_v11  ;;  %625 = vst [vmem:[#allocation11 + $0x8] sm:$0xff] %v597_v17 }
 0x1a3   :  { %424 = vst [vmem:[#allocation10] sm:$0xff] %v414_v10 }
 0x1a4   :  { %425 = vst [vmem:[#allocation10 + $0x8] sm:$0xff] %v415_v18  ;;  %v391_v20 = vpop.f32.mrb[12].mxu1  ;;  %v601_v21 = vpop.f32.mrb[2].mxu0 }
 0x1a5   :  { %v416_v40 = vsub.f32 %v296_v51, %v391_v20  ;;  %626 = vst [vmem:[#allocation11 + $0x10] sm:$0xff] %v601_v21  ;;  %v393_v43 = vpop.f32.mrb[13].mxu1  ;;  %v603_v44 = vpop.f32.mrb[3].mxu0 }
 0x1a6   :  { %v417_v46 = vsub.f32 %v298_v52, %v393_v43  ;;  %627 = vst [vmem:[#allocation11 + $0x18] sm:$0xff] %v603_v44 }
 0x1a7   :  { %426 = vst [vmem:[#allocation10 + $0x10] sm:$0xff] %v416_v40 }
 0x1a8   :  { %427 = vst [vmem:[#allocation10 + $0x18] sm:$0xff] %v417_v46  ;;  %v397_v41 = vpop.f32.mrb[14].mxu1  ;;  %v607_v47 = vpop.f32.mrb[4].mxu0 }
 0x1a9   :  { %v418_v48 = vsub.f32 %v302_v54, %v397_v41  ;;  %628 = vst [vmem:[#allocation11 + $0x20] sm:$0xff] %v607_v47  ;;  %v399_v49 = vpop.f32.mrb[15].mxu1  ;;  %v609_v50 = vpop.f32.mrb[5].mxu0 }
 0x1aa   :  { %v419_v53 = vsub.f32 %v304_v55, %v399_v49  ;;  %629 = vst [vmem:[#allocation11 + $0x28] sm:$0xff] %v609_v50 }
 0x1ab   :  { %428 = vst [vmem:[#allocation10 + $0x20] sm:$0xff] %v418_v48 }
 0x1ac   :  { %429 = vst [vmem:[#allocation10 + $0x28] sm:$0xff] %v419_v53  ;;  %v403_v56 = vpop.f32.mrb[16].mxu1  ;;  %v613_v57 = vpop.f32.mrb[6].mxu0 }
 0x1ad   :  { %v420_v58 = vsub.f32 %v308_v61, %v403_v56  ;;  %630 = vst [vmem:[#allocation11 + $0x30] sm:$0xff] %v613_v57  ;;  %v405_v59 = vpop.f32.mrb[17].mxu1  ;;  %v615_v60 = vpop.f32.mrb[7].mxu0 }
 0x1ae   :  { %v421_v63 = vsub.f32 %v310_v62, %v405_v59  ;;  %631 = vst [vmem:[#allocation11 + $0x38] sm:$0xff] %v615_v60 }
 0x1af   :  { %430 = vst [vmem:[#allocation10 + $0x30] sm:$0xff] %v420_v58 }
 0x1b0   :  { %431 = vst [vmem:[#allocation10 + $0x38] sm:$0xff] %v421_v63  ;;  %v409_v2 = vpop.f32.mrb[18].mxu1  ;;  %v619_v3 = vpop.f32.mrb[8].mxu0 }
 0x1b1   :  { %v422_v4 = vsub.f32 %v314_v0, %v409_v2  ;;  %632 = vst [vmem:[#allocation11 + $0x40] sm:$0x3f] %v619_v3  ;;  %v411_v5 = vpop.f32.mrb[19].mxu1  ;;  %v621_v6 = vpop.f32.mrb[9].mxu0 }
 0x1b2   :  { %v423_v9 = vsub.f32 %v1277_v1, %v411_v5  ;;  %633 = vst [vmem:[#allocation11 + $0x48] sm:$0x3f] %v621_v6 }
 0x1b3   :  { %432 = vst [vmem:[#allocation10 + $0x40] sm:$0x3f] %v422_v4 }
 0x1b4   :  { %1042 = shalt.err (!%p1039_p8)
}
 0x1b5   :  { %s1043_s23 = scalar_lea.hbm %s1322_s5, 1280 }
 0x1b6   :  { %p1044_p9 = scmp.ne.s32.totalorder %s1322_s5, %s1043_s23  ;;  %p1047_p10 = scmp.lt.u32.totalorder %s1043_s23, %s1322_s5 }
 0x1b8   :  { %p1049_p11 = pnand %p1047_p10, %p1044_p9 }
 0x1ba   :  { %1052 = shalt.err (!%p1049_p11)
}
 0x1bb   :  { %657 = dma.vmem_to_hbm [thread:$0]  %s652_s1, 1280, %s1322_s5, [#allocation12], %s1087_s30, %s1087_s30, %s1088_s6   ;;  %433 = vst [vmem:[#allocation10 + $0x48] sm:$0x3f] %v423_v9 }
 0x1bc   :  { %s1053_s0 = scalar_lea.vmem %s1280_s18, 1280  ;;  %p1058_p13 = scmp.lt.s32.totalorder %s1280_s18, %s1280_s18 }
 0x1bd   :  { %p1054_p12 = scmp.ne.s32.totalorder %s1280_s18, %s1053_s0  ;;  %p1059_p0 = scmp.lt.s32.totalorder %s1053_s0, %s1053_s0 }
 0x1bf   :  { %p1060_p1 = por %p1059_p0, %p1058_p13 }
 0x1c1   :  { %p1061_p2 = pnand %p1060_p1, %p1054_p12 }
 0x1c3   :  { %1064 = shalt.err (!%p1061_p2)
}
 0x1c4   :  { %s1065_s8 = scalar_lea.hbm %s1321_s4, 1280 }
 0x1c5   :  { %p1066_p3 = scmp.ne.s32.totalorder %s1321_s4, %s1065_s8  ;;  %p1069_p4 = scmp.lt.u32.totalorder %s1065_s8, %s1321_s4 }
 0x1c7   :  { %p1071_p5 = pnand %p1069_p4, %p1066_p3 }
 0x1c9   :  { %1074 = shalt.err (!%p1071_p5)
}
 0x1ca   :  { %645 = dma.vmem_to_hbm [thread:$0]  %s1280_s18, 1280, %s1321_s4, [#allocation4], %s1087_s30, %s1087_s30, %s1088_s6  }
 0x1cb   :  { %1081 = dma.done.wait [#allocation4], 1280  }
 0x1cc   :  { %1082 = vsyncadd [#allocation4], 4294966016 }
 0x1cd   :  { %1083 = dma.done.wait [#allocation12], 1280  }
 0x1ce   :  { %1084 = vsyncadd [#allocation12], 4294966016 }
 0x1cf   :  { %664 = vsyncpa [#allocation3], 1 }
 0x1d0   :  { %665 = vsyncpa [#allocation6], 1 }
 0x1d1   :  { %666 = vsyncpa [#allocation9], 1 }
 0x1d2   :  { %667 = vsyncpa [#allocation4], 1 }
 0x1d3   :  { %668 = vsyncpa [#allocation12], 1 }

</bundles_post_ra>
